<compile_context>
chip_gen: v7x
topology: tpu7x:2x2x1
jax: 0.10.0
libtpu: 0.0.40
codegen_flags: <defaults>
</compile_context>

<pallas_src>
import functools

import jax
import jax.numpy as jnp
from jax.experimental import pallas as pl
from jax.experimental.pallas import tpu as pltpu


# ----------------------------- Pallas kernel -----------------------------

def _tgcn_gconv_kernel(l_ref, c_ref, w_ref, b_ref, out_ref, *, batch, k_dim, m_dim):
    # l_ref   : (tn, N)     row tile of the laplacian (compute dtype)
    # c_ref   : (N, B*K)    batch-folded concat, resident (compute dtype)
    # w_ref   : (K, M)      flattened weights, resident (compute dtype)
    # b_ref   : (1, M)      bias, f32
    # out_ref : (tn, B*M)   lane-folded output row tile, f32
    #
    # Single lane-dense graph-conv matmul for ALL batch elements at once.
    a = jnp.dot(l_ref[...], c_ref[...],
                preferred_element_type=jnp.float32)          # (tn, B*K) f32
    a = a.astype(w_ref.dtype)                                # feed MXU natively

    bias = b_ref[...]                                        # (1, M) f32
    # Per-batch dense contraction with the shared weight matrix.  `batch` is a
    # static Python int, so this unrolls at trace time; slices are static.
    for b in range(batch):
        a_b = a[:, b * k_dim:(b + 1) * k_dim]                # (tn, K)
        o_b = jnp.dot(a_b, w_ref[...],
                      preferred_element_type=jnp.float32) + bias   # (tn, M)
        out_ref[:, b * m_dim:(b + 1) * m_dim] = o_b.astype(out_ref.dtype)


def _pick_row_tile(n):
    """Row tile for L / the output: full array when small, 8-aligned tile else."""
    if n <= 256:
        return n
    for t in (512, 256, 128, 64, 32, 16, 8):
        if n % t == 0:
            return t
    return n


def tgcn_graph_convolution(laplacian, concat_packed, w_flat, bias_flat, *, batch):
    """laplacian (N,N), concat_packed (N,B*K), w_flat (K,M), bias_flat (1,M)
    -> out_packed (N, B*M) in f32."""
    N = laplacian.shape[0]
    BK = concat_packed.shape[1]
    K, M = w_flat.shape
    BM = batch * M
    tn = _pick_row_tile(N)

    # VMEM budget: double-buffered L row tile + resident concat/W/bias +
    # double-buffered out tile (4 B worst case).  Floor 32 MiB (safe on every
    # generation), cap 64 MiB (v7x physical VMEM).
    est_bytes = 4 * (2 * tn * N + N * BK + K * M + M + 2 * tn * BM)
    vmem_limit = int(min(max(32 * 1024 * 1024, 2 * est_bytes), 64 * 1024 * 1024))

    kernel = functools.partial(_tgcn_gconv_kernel, batch=batch, k_dim=K, m_dim=M)

    return pl.pallas_call(
        kernel,
        out_shape=jax.ShapeDtypeStruct((N, BM), jnp.float32),
        grid_spec=pltpu.PrefetchScalarGridSpec(
            num_scalar_prefetch=0,
            grid=(pl.cdiv(N, tn),),
            in_specs=[
                # Pipelined L row tile (the only block whose index varies).
                pl.BlockSpec((tn, N), lambda i: (i, 0)),
                # Constant index maps: copied once, stay resident across tiles.
                pl.BlockSpec((N, BK), lambda i: (0, 0)),
                pl.BlockSpec((K, M), lambda i: (0, 0)),
                pl.BlockSpec((1, M), lambda i: (0, 0)),
            ],
            out_specs=pl.BlockSpec((tn, BM), lambda i: (i, 0)),
        ),
        compiler_params=pltpu.CompilerParams(
            dimension_semantics=("parallel",),
            vmem_limit_bytes=vmem_limit,
        ),
    )(laplacian, concat_packed, w_flat, bias_flat)


# ----------------------------- Plain-JAX glue -----------------------------

def calculate_laplacian_with_self_loop(matrix):
    n = matrix.shape[0]
    matrix = matrix + jnp.eye(n, dtype=matrix.dtype)
    row_sum = matrix.sum(axis=1)
    d_inv_sqrt = jnp.power(row_sum, -0.5).reshape(-1)
    d_inv_sqrt = jnp.where(jnp.isinf(d_inv_sqrt), 0.0, d_inv_sqrt)
    d_mat_inv_sqrt = jnp.diag(d_inv_sqrt)
    return (matrix @ d_mat_inv_sqrt).T @ d_mat_inv_sqrt


def xavier_uniform(key, shape, dtype=jnp.float32):
    # matches torch.nn.init.xavier_uniform_ fan computation for 4-D tensors
    receptive = 1
    for s in shape[2:]:
        receptive *= s
    fan_in = shape[1] * receptive
    fan_out = shape[0] * receptive
    bound = jnp.sqrt(6.0 / (fan_in + fan_out))
    return jax.random.uniform(key, shape, dtype, minval=-bound, maxval=bound)


class TGCNGraphConvolutionPallas:
    def __init__(self, adj, num_gru_units, output_dim, input_channels,
                 output_channels, bias=0.0, *, key, compute_dtype=jnp.float32):
        self.G = num_gru_units
        self.D = output_dim
        self.C = input_channels
        self.OC = output_channels
        self.compute_dtype = compute_dtype
        self.laplacian = calculate_laplacian_with_self_loop(adj)
        self.weights = xavier_uniform(
            key, (num_gru_units + 1, output_dim, input_channels, output_channels)
        )
        self.biases = jnp.full((output_dim, output_channels), bias, jnp.float32)

    def __call__(self, x, h):
        # x: (B, N, C);  h: (B, N, G*C)
        B, N, C = x.shape
        G, D, OC = self.G, self.D, self.OC
        K = (G + 1) * C
        M = D * OC

        x4 = x.reshape(B, N, 1, C)
        h4 = h.reshape(B, N, G, C)
        concat = jnp.concatenate([x4, h4], axis=2).reshape(B, N, K)
        # Fold batch into the lane axis: (N, B*K), columns b-major / k-minor.
        concat_packed = jnp.transpose(concat, (1, 0, 2)).reshape(N, B * K)

        # W_flat[g*C + j, d*OC + i] = weights[g, d, j, i]
        w_flat = jnp.transpose(self.weights, (0, 2, 1, 3)).reshape(K, M)
        bias_flat = self.biases.reshape(1, M)

        cd = self.compute_dtype
        out_packed = tgcn_graph_convolution(
            self.laplacian.astype(cd),
            concat_packed.astype(cd),
            w_flat.astype(cd),
            bias_flat.astype(jnp.float32),
            batch=B,
        )                                                     # (N, B*M) f32

        # (N, B*M) -> (B, N, D, OC) -> (B, N*D, OC)  (pure layout glue)
        out = out_packed.reshape(N, B, D, OC)
        out = jnp.transpose(out, (1, 0, 2, 3))
        return out.reshape(B, N * D, OC)


# ----------------------------- Reference (plain JAX) -----------------------------

def reference_forward(laplacian, weights, biases, x, h, G, D, C, OC):
    B, N, _ = x.shape
    concat = jnp.concatenate(
        [x.reshape(B, N, 1, C), h.reshape(B, N, G, C)], axis=2
    )                                                    # (B, N, G+1, C)
    at = jnp.einsum("nm,bmgc->bngc", laplacian, concat)  # (B, N, G+1, C)
    out = jnp.einsum("bngc,gdco->bndo", at, weights) + biases  # (B, N, D, OC)
    return out.reshape(B, N * D, OC)


# ----------------------------- Main -----------------------------

if __name__ == "__main__":
    B = 2             # batch
    N = 16            # num_nodes
    C = 4             # input_channels
    G = 8             # num_gru_units
    D = 4             # output_dim
    OC = 4            # output_channels

    key = jax.random.PRNGKey(0)
    k_adj, k_w, k_x, k_h = jax.random.split(key, 4)

    adj_raw = jax.random.uniform(k_adj, (N, N), jnp.float32)
    adj = 0.5 * (adj_raw + adj_raw.T)                    # symmetric adjacency

    x = jax.random.normal(k_x, (B, N, C), jnp.float32)
    h = jax.random.normal(k_h, (B, N, G * C), jnp.float32)

    # ---- f32 path (strict check) ----
    layer = TGCNGraphConvolutionPallas(
        adj, num_gru_units=G, output_dim=D, input_channels=C,
        output_channels=OC, bias=0.0, key=k_w, compute_dtype=jnp.float32,
    )
    out = jax.block_until_ready(layer(x, h))

    ref = reference_forward(
        layer.laplacian, layer.weights, layer.biases, x, h, G, D, C, OC
    )
    assert out.shape == (B, N * D, OC), out.shape
    assert jnp.allclose(out, ref, atol=1e-3, rtol=1e-3), (
        float(jnp.max(jnp.abs(out - ref)))
    )

    # ---- bf16-input / f32-accumulate path (v6e/v7x MXU-native, loose check) ----
    layer_bf16 = TGCNGraphConvolutionPallas(
        adj, num_gru_units=G, output_dim=D, input_channels=C,
        output_channels=OC, bias=0.0, key=k_w, compute_dtype=jnp.bfloat16,
    )
    out_bf16 = jax.block_until_ready(layer_bf16(x, h))
    assert out_bf16.shape == (B, N * D, OC), out_bf16.shape
    assert jnp.allclose(out_bf16, ref, atol=5e-2, rtol=5e-2), (
        float(jnp.max(jnp.abs(out_bf16 - ref)))
    )

    print("KERNEL_OK")
</pallas_src>

<mosaic_0001>
module attributes {stable_mosaic.version = 11 : i64} {
  func.func @_tgcn_gconv_kernel(%arg0: i32, %arg1: memref<16x16xf32, #tpu.memory_space<vmem>>, %arg2: memref<16x72xf32, #tpu.memory_space<vmem>>, %arg3: memref<36x16xf32, #tpu.memory_space<vmem>>, %arg4: memref<1x16xf32, #tpu.memory_space<vmem>>, %arg5: memref<16x32xf32, #tpu.memory_space<vmem>>) attributes {dimension_semantics = [#tpu.dimension_semantics<parallel>], iteration_bounds = array<i64: 1>, scalar_prefetch = 0 : i64, scratch_operands = 0 : i64, tpu.core_type = #tpu.core_type<tc>, window_params = [{transform_indices = @transform_0, window_bounds = array<i64: 16, 16>}, {pipeline_mode = #tpu.pipeline_mode<synchronous>, transform_indices = @transform_1, window_bounds = array<i64: 16, 72>}, {pipeline_mode = #tpu.pipeline_mode<synchronous>, transform_indices = @transform_2, window_bounds = array<i64: 36, 16>}, {pipeline_mode = #tpu.pipeline_mode<synchronous>, transform_indices = @transform_3, window_bounds = array<i64: 1, 16>}, {transform_indices = @transform_4, window_bounds = array<i64: 16, 32>}]} {
    %c0 = arith.constant 0 : index
    %c0_0 = arith.constant 0 : index
    %0 = vector.load %arg1[%c0, %c0_0] : memref<16x16xf32, #tpu.memory_space<vmem>>, vector<16x16xf32>
    %c0_1 = arith.constant 0 : index
    %c0_2 = arith.constant 0 : index
    %1 = vector.load %arg2[%c0_1, %c0_2] : memref<16x72xf32, #tpu.memory_space<vmem>>, vector<16x72xf32>
    %cst = arith.constant dense<0.000000e+00> : vector<16x72xf32>
    %2 = tpu.matmul %0, %1, %cst {dimension_numbers = #tpu.dot_dimension_numbers<[1], [0], [0], [1], [0, 0, 1, 1], [], []>} : vector<16x16xf32>, vector<16x72xf32>, vector<16x72xf32> -> vector<16x72xf32>
    %c0_3 = arith.constant 0 : index
    %c0_4 = arith.constant 0 : index
    %3 = vector.load %arg4[%c0_3, %c0_4] : memref<1x16xf32, #tpu.memory_space<vmem>>, vector<1x16xf32>
    %4 = vector.extract_strided_slice %2 {offsets = [0, 0], sizes = [16, 36], strides = [1, 1]} : vector<16x72xf32> to vector<16x36xf32>
    %c0_5 = arith.constant 0 : index
    %c0_6 = arith.constant 0 : index
    %5 = vector.load %arg3[%c0_5, %c0_6] : memref<36x16xf32, #tpu.memory_space<vmem>>, vector<36x16xf32>
    %cst_7 = arith.constant dense<0.000000e+00> : vector<16x16xf32>
    %6 = tpu.matmul %4, %5, %cst_7 {dimension_numbers = #tpu.dot_dimension_numbers<[1], [0], [0], [1], [0, 0, 1, 1], [], []>} : vector<16x36xf32>, vector<36x16xf32>, vector<16x16xf32> -> vector<16x16xf32>
    %7 = vector.broadcast %3 : vector<1x16xf32> to vector<16x16xf32>
    %8 = arith.addf %6, %7 : vector<16x16xf32>
    %c0_8 = arith.constant 0 : index
    %c0_9 = arith.constant 0 : index
    %9 = vector.load %arg5[%c0_8, %c0_9] : memref<16x32xf32, #tpu.memory_space<vmem>>, vector<16x16xf32>
    tpu.vector_store %arg5[%c0_8, %c0_9], %8 {strides = array<i32>} : memref<16x32xf32, #tpu.memory_space<vmem>>, vector<16x16xf32>,
    %10 = vector.extract_strided_slice %2 {offsets = [0, 36], sizes = [16, 36], strides = [1, 1]} : vector<16x72xf32> to vector<16x36xf32>
    %c0_10 = arith.constant 0 : index
    %c0_11 = arith.constant 0 : index
    %11 = vector.load %arg3[%c0_10, %c0_11] : memref<36x16xf32, #tpu.memory_space<vmem>>, vector<36x16xf32>
    %cst_12 = arith.constant dense<0.000000e+00> : vector<16x16xf32>
    %12 = tpu.matmul %10, %11, %cst_12 {dimension_numbers = #tpu.dot_dimension_numbers<[1], [0], [0], [1], [0, 0, 1, 1], [], []>} : vector<16x36xf32>, vector<36x16xf32>, vector<16x16xf32> -> vector<16x16xf32>
    %13 = vector.broadcast %3 : vector<1x16xf32> to vector<16x16xf32>
    %14 = arith.addf %12, %13 : vector<16x16xf32>
    %c0_13 = arith.constant 0 : index
    %c16 = arith.constant 16 : index
    %15 = vector.load %arg5[%c0_13, %c16] : memref<16x32xf32, #tpu.memory_space<vmem>>, vector<16x16xf32>
    tpu.vector_store %arg5[%c0_13, %c16], %14 {strides = array<i32>} : memref<16x32xf32, #tpu.memory_space<vmem>>, vector<16x16xf32>,
    return
  }
  func.func @transform_0(%arg0: i32) -> (i32, i32) {
    %c0_i32 = arith.constant 0 : i32
    %c0_i32_0 = arith.constant 0 : i32
    return %arg0, %c0_i32 : i32, i32
  }
  func.func @transform_1(%arg0: i32) -> (i32, i32) {
    %c0_i32 = arith.constant 0 : i32
    %c0_i32_0 = arith.constant 0 : i32
    %c0_i32_1 = arith.constant 0 : i32
    return %c0_i32, %c0_i32_0 : i32, i32
  }
  func.func @transform_2(%arg0: i32) -> (i32, i32) {
    %c0_i32 = arith.constant 0 : i32
    %c0_i32_0 = arith.constant 0 : i32
    %c0_i32_1 = arith.constant 0 : i32
    return %c0_i32, %c0_i32_0 : i32, i32
  }
  func.func @transform_3(%arg0: i32) -> (i32, i32) {
    %c0_i32 = arith.constant 0 : i32
    %c0_i32_0 = arith.constant 0 : i32
    %c0_i32_1 = arith.constant 0 : i32
    return %c0_i32, %c0_i32_0 : i32, i32
  }
  func.func @transform_4(%arg0: i32) -> (i32, i32) {
    %c0_i32 = arith.constant 0 : i32
    %c0_i32_0 = arith.constant 0 : i32
    return %arg0, %c0_i32 : i32, i32
  }
}

</mosaic_0001>

<bundles_post_ra>
// kernel: tpu_custom_call.1
= control target key start
LH: loop header
LB: loop body
LE: loop exit
PB: predicated region body
PF: predicated region fallthrough
CT: control target
= control target key end

     0   :  { %vm22_vm0 = vcmask 130048   ;;  %s510_s0 = inlined_call_operand.vmem [shape: f32[16,16], index: 0, kind: input, shape index: {}]   ;;  %s511_s1 = inlined_call_operand.vmem [shape: f32[16,72], index: 1, kind: input, shape index: {}]   ;;  %s512_s2 = inlined_call_operand.vmem [shape: f32[36,16], index: 2, kind: input, shape index: {}]   ;;  %s513_s3 = inlined_call_operand.vmem [shape: f32[1,16], index: 3, kind: input, shape index: {}]   ;;  %s514_s4 = inlined_call_operand.hbm [shape: f32[16,32], index: 4, kind: output, shape index: {}]  }
   0x1   :  { %v20_v0 = vld [vmem:[%s511_s1] sm:$0xff]  ;;  %v21_v1 = vld [vmem:[%s511_s1 + $0x8] sm:$0xff]  ;;  %v107_v7 = vld [vmem:[%s512_s2 + $0x10] sm:$0xff] }
   0x2   :  { %v18_v2 = vld [vmem:[%s510_s0] sm:$0xff]  ;;  %v382_v3 = vpack.c.bf16 %v21_v1, %v20_v0  ;;  %v106_v5 = vld [vmem:[%s512_s2 + $0x8] sm:$0xff]  ;;  %v108_v8 = vld [vmem:[%s512_s2 + $0x18] sm:$0xff] }
   0x3   :  { %353 = vmatprep.mubr.msk.f32.mxu0 %vm22_vm0, %v18_v2  ;;  %v105_v4 = vld [vmem:[%s512_s2] sm:$0xff] }
   0x4   :  { %v386_v6 = vpack.c.bf16 %v106_v5, %v105_v4 }
   0x5   :  { %9 = vsyncpa [#allocation3], 0  ;;  %383 = vmatprep.subr.bf16.mxu0 %v382_v3  ;;  %v390_v9 = vpack.c.bf16 %v108_v8, %v107_v7  ;;  %v19_v10 = vld [vmem:[%s510_s0 + $0x8] sm:$0xff]  ;;  %v109_v11 = vld [vmem:[%s512_s2 + $0x20] sm:$0xf]  ;;  %vm123_vm1 = vcmask 1043456  }
   0x6   :  { %385 = vmatpush3.bf16.msra.mxu0 %v382_v3  ;;  %387 = vmatprep.subr.bf16.mxu1 %v386_v6  ;;  %v208_v12 = vld [vmem:[%s512_s2 + $0x20] sm:$0xf]  ;;  %vm116_vm2 = vcmask 293888   ;;  %s431_s0 = smov 92   ;;  %s432_s2 = smov 16   ;;  %vm303_vm3 = vcmask 261248  }
   0x7   :  { %389 = vmatpush3.bf16.msra.mxu1 %v386_v6  ;;  %395 = vmatprep.subr.bf16.mxu0 %v386_v6  ;;  %v324_v17 = vld [vmem:[%s513_s3] ss:$0 sm:$0xff]  ;;  %s433_s10 = smov [#allocation2]  }
   0x8   :  { %391 = vmatprep.subr.bf16.mxu1 %v390_v9  ;;  %s311_s11 = sshll.u32 %s433_s10, 4  ;;  %s312_s11 = int_to_ptr.vmem [resolvable:$true] %s311_s11 }
   0x9   :  { %354 = vmatmul.mubr.msk.f32.vlgmr.msra.gmra.mrb[0].mxu0 %vm22_vm0, %v19_v10  ;;  %s407_s3 = scalar_lea.vmem %s312_s11, 256  ;;  %p412_p1 = scmp.lt.s32.totalorder %s312_s11, %s312_s11 }
   0xa   :  { %397 = vmatpush3.bf16.msra.mxu0 %v386_v6  ;;  %p408_p0 = scmp.ne.s32.totalorder %s312_s11, %s407_s3  ;;  %p413_p2 = scmp.lt.s32.totalorder %s407_s3, %s407_s3 }
   0xb   :  { %393 = vmatpush3.bf16.msra.mxu1 %v390_v9  ;;  %399 = vmatprep.subr.bf16.mxu0 %v390_v9 }
   0xc   :  { %364 = vmatprep.subr.msk.mxu1 %vm123_vm1, %v109_v11  ;;  %p414_p3 = por %p413_p2, %p412_p1 }
   0xe   :  { %401 = vmatpush3.bf16.msra.mxu0 %v390_v9  ;;  %p415_p4 = pnand %p414_p3, %p408_p0 }
   0xf   :  { %365 = vmatpush3.msk.msra.mxu1 %vm123_vm1, %v109_v11  ;;  %377 = vmatprep.subr.msk.mxu0 %vm123_vm1, %v208_v12 }
  0x12   :  { %378 = vmatpush3.msk.msra.mxu0 %vm123_vm1, %v208_v12 }
  0xdc   :  { %v355_v13 = vpop.f32.mrb[0].mxu0 }
  0xdd   :  { %v95_v14 = vpop.f32.mrb[1].mxu0 }
  0xde   :  { %209 = vrot.lane.b32.xlu0 %v95_v14, %s431_s0  ;;  %366 = vmatprep.mubr.msk.f32.mxu1 %vm116_vm2, %v95_v14 }
  0xdf   :  { %367 = vmatmul.mubr.msk.f32.vlgmr.msra.gmra.mrb[0].mxu1 %vm116_vm2, %v355_v13 }
  0xe2   :  { %211 = vrot.lane.b32.xlu0 %v355_v13, %s431_s0 }
 0x150   :  { %v210_v15 = vpop.permute.xlu0 %209 }
 0x151   :  { %379 = vmatprep.mubr.msk.f32.mxu0 %vm116_vm2, %v210_v15 }
 0x154   :  { %v212_v16 = vpop.permute.xlu0 %211 }
 0x155   :  { %380 = vmatmul.mubr.msk.f32.vlgmr.msra.gmra.mrb[2].mxu0 %vm116_vm2, %v212_v16 }
 0x1b2   :  { %v368_v18 = vpop.f32.mrb[0].mxu1 }
 0x1b3   :  { %v199_v19 = vadd.f32 %v368_v18, %v324_v17  ;;  %v193_v20 = vpop.f32.mrb[1].mxu1 }
 0x1b4   :  { %v194_v21 = vadd.f32 %v324_v17, %v193_v20 }
 0x1b5   :  { %203 = vst.msk [vmem:[#allocation2 + $0x8] sm:$0xff] %vm22_vm0, %v199_v19 }
 0x1b6   :  { %202 = vst.msk [vmem:[#allocation2] sm:$0xff] %vm22_vm0, %v194_v21 }
 0x228   :  { %v381_v22 = vpop.f32.mrb[2].mxu0 }
 0x229   :  { %v286_v23 = vpop.f32.mrb[3].mxu0  ;;  %v292_v25 = vadd.f32 %v381_v22, %v324_v17 }
 0x22a   :  { %v287_v24 = vadd.f32 %v324_v17, %v286_v23 }
 0x22c   :  { %297 = vrot.lane.b32.xlu1 %v287_v24, %s432_s2 }
 0x230   :  { %299 = vrot.lane.b32.xlu1 %v292_v25, %s432_s2 }
 0x29e   :  { %v298_v26 = vpop.permute.xlu1 %297 }
 0x29f   :  { %304 = vst.msk [vmem:[#allocation2] sm:$0xff] %vm303_vm3, %v298_v26 }
 0x2a2   :  { %v300_v27 = vpop.permute.xlu1 %299 }
 0x2a3   :  { %305 = vst.msk [vmem:[#allocation2 + $0x8] sm:$0xff] %vm303_vm3, %v300_v27 }
 0x2a4   :  { %418 = shalt.err (!%p415_p4)
}
 0x2a5   :  { %s419_s14 = scalar_lea.hbm %s514_s4, 256 }
 0x2a6   :  { %p420_p5 = scmp.ne.s32.totalorder %s514_s4, %s419_s14  ;;  %p423_p6 = scmp.lt.u32.totalorder %s419_s14, %s514_s4 }
 0x2a8   :  { %p425_p7 = pnand %p423_p6, %p420_p5 }
 0x2aa   :  { %428 = shalt.err (!%p425_p7)
}
 0x2ab   :  { %s434_s19 = smov 128   ;;  %s435_s20 = smov 8  }
 0x2ac   :  { %317 = dma.vmem_to_hbm [thread:$0]  %s312_s11, 256, %s514_s4, [#allocation3], %s434_s19, %s434_s19, %s435_s20  }
 0x2ad   :  { %429 = dma.done.wait [#allocation3], 256  }
 0x2ae   :  { %430 = vsyncadd [#allocation3], 4294967040 }
 0x2af   :  { %321 = vsyncpa [#allocation3], 1 }

</bundles_post_ra>
